<compile_context>
chip_gen: v5e
topology: v5e:2x2
jax: 0.10.0
libtpu: 0.0.40
codegen_flags: <defaults>
</compile_context>

<pallas_src>
import functools
import math

import jax
import jax.numpy as jnp
from jax.experimental import pallas as pl
from jax.experimental.pallas import tpu as pltpu

# ----------------------------- small synthetic config -----------------------------
VOCAB = 64
HIDDEN = 256          # multiple of 128 -> lane-dense activations
HEADS = 2
HEAD_DIM = HIDDEN // HEADS   # 128 -> lane-dense per-head slices, no XLU shuffles
FF = 512              # multiple of 128 -> lane-dense FF intermediate
ENC_LAYERS = 2
DEC_LAYERS = 2
MAX_POS = 64
TYPE_VOCAB = 2
BERT_LN_EPS = 1e-12
DEC_LN_EPS = 1e-6
ATTN_SCALE = 1.0 / math.sqrt(HEAD_DIM)

_VMEM = pltpu.MemorySpace.VMEM


# ------------------------------ in-kernel helpers ----------------------------------
def _mm(x, w, b):
    # bf16 MXU inputs, f32 accumulation; bias add in f32.
    return jnp.dot(x.astype(jnp.bfloat16), w, preferred_element_type=jnp.float32) + b


def _ln(y, g, b, eps):
    mu = jnp.mean(y, axis=-1, keepdims=True)
    yc = y - mu
    var = jnp.mean(yc * yc, axis=-1, keepdims=True)
    return yc * jax.lax.rsqrt(var + eps) * g + b


def _act(y, activation):
    if activation == "gelu_erf":           # BERT / transformers gelu
        return 0.5 * y * (1.0 + jax.lax.erf(y * (1.0 / math.sqrt(2.0))))
    if activation == "gelu_tanh":          # PreSumm neural.gelu (tanh approximation)
        c = math.sqrt(2.0 / math.pi)
        return 0.5 * y * (1.0 + jnp.tanh(c * (y + 0.044715 * y * y * y)))
    return y


def _mha(q_all, k_all, v_all, bias):
    # q_all: (Lq, H) f32, already scaled by 1/sqrt(head_dim); k_all/v_all: (Lk, H) f32
    # (or bf16); bias: (1|Lq, Lk) f32 additive mask shared across heads.
    # HEAD_DIM == 128 -> every slice below is a full-lane, lane-aligned slice.
    outs = []
    for h in range(HEADS):
        lo = h * HEAD_DIM
        q = q_all[:, lo:lo + HEAD_DIM].astype(jnp.bfloat16)
        k = k_all[:, lo:lo + HEAD_DIM].astype(jnp.bfloat16)
        v = v_all[:, lo:lo + HEAD_DIM].astype(jnp.bfloat16)
        s = jax.lax.dot_general(q, k, (((1,), (1,)), ((), ())),
                                preferred_element_type=jnp.float32) + bias
        m = jnp.max(s, axis=-1, keepdims=True)
        p = jnp.exp(s - m)
        p = p * pl.reciprocal(jnp.sum(p, axis=-1, keepdims=True), approx=True)
        outs.append(jnp.dot(p.astype(jnp.bfloat16), v,
                            preferred_element_type=jnp.float32))
    return outs[0] if HEADS == 1 else jnp.concatenate(outs, axis=-1)


# ----------------------------------- kernels --------------------------------------
def _enc_layer_kernel(x_ref, bias_ref,
                      wqkv_ref, bqkv_ref, wo_ref, bo_ref, ln1g_ref, ln1b_ref,
                      w1_ref, b1_ref, w2_ref, b2_ref, ln2g_ref, ln2b_ref,
                      o_ref, *, eps):
    # One whole post-LN BERT encoder layer for one batch element.
    x = x_ref[0]               # (Ls, H) f32
    bias = bias_ref[0]         # (1, Ls) key-only additive mask
    H = HIDDEN

    qkv = _mm(x, wqkv_ref[...], bqkv_ref[...])                 # fused Q|K|V
    ctx = _mha(qkv[:, 0:H] * ATTN_SCALE,                        # scale folded into Q
               qkv[:, H:2 * H], qkv[:, 2 * H:3 * H], bias)

    y = _mm(ctx, wo_ref[...], bo_ref[...]) + x                  # out-proj + residual
    x1 = _ln(y, ln1g_ref[...], ln1b_ref[...], eps)

    ff1 = _act(_mm(x1, w1_ref[...], b1_ref[...]), "gelu_erf")
    y2 = _mm(ff1, w2_ref[...], b2_ref[...]) + x1
    o_ref[0] = _ln(y2, ln2g_ref[...], ln2b_ref[...], eps)


def _dec_layer_kernel(x_ref, mem_ref, sbias_ref, cbias_ref,
                      ln1g_ref, ln1b_ref, wqkv_ref, bqkv_ref, wo_ref, bo_ref,
                      ln2g_ref, ln2b_ref, cwq_ref, cbq_ref, cwkv_ref, cbkv_ref,
                      cwo_ref, cbo_ref, lnffg_ref, lnffb_ref,
                      w1_ref, b1_ref, w2_ref, b2_ref,
                      o_ref, *, eps):
    # One whole pre-LN PreSumm decoder layer for one batch element.
    x = x_ref[0]               # (Lt, H) f32 residual stream (never leaves VMEM here)
    mem = mem_ref[0]           # (Ls, H) bf16 encoder memory
    sbias = sbias_ref[0]       # (Lt, Lt) pad|causal additive mask
    cbias = cbias_ref[0]       # (1, Ls)  src-pad additive mask
    H = HIDDEN

    # masked self-attention (pre-LN)
    inp_norm = _ln(x, ln1g_ref[...], ln1b_ref[...], eps)
    qkv = _mm(inp_norm, wqkv_ref[...], bqkv_ref[...])           # fused Q|K|V
    sa = _mha(qkv[:, 0:H] * ATTN_SCALE, qkv[:, H:2 * H], qkv[:, 2 * H:3 * H], sbias)
    query = _mm(sa, wo_ref[...], bo_ref[...]) + x

    # cross-attention over encoder memory (K|V fused)
    qn = _ln(query, ln2g_ref[...], ln2b_ref[...], eps)
    cq = _mm(qn, cwq_ref[...], cbq_ref[...]) * ATTN_SCALE
    ckv = _mm(mem, cwkv_ref[...], cbkv_ref[...])
    ca = _mha(cq, ckv[:, 0:H], ckv[:, H:2 * H], cbias)
    mid = _mm(ca, cwo_ref[...], cbo_ref[...]) + query

    # PositionwiseFeedForward: mid + w2(gelu_tanh(w1(LN(mid))))
    ffn = _ln(mid, lnffg_ref[...], lnffb_ref[...], eps)
    ff1 = _act(_mm(ffn, w1_ref[...], b1_ref[...]), "gelu_tanh")
    o_ref[0] = _mm(ff1, w2_ref[...], b2_ref[...]) + mid


def _layernorm_kernel(x_ref, g_ref, b_ref, o_ref, *, eps):
    o_ref[...] = _ln(x_ref[...], g_ref[...], b_ref[...], eps)


# --------------------------------- kernel wrappers ----------------------------------
def _wspec(shape):
    # Weight/bias spec: same block every grid step (stays resident, no re-fetch).
    zeros = (0,) * len(shape)
    return pl.BlockSpec(shape, lambda b, z=zeros: z)


def enc_layer_forward(x, bias, lyr):
    # x: (B, Ls, H) f32; bias: (B, 1, Ls) f32
    B, Ls, H = x.shape
    in_specs = [
        pl.BlockSpec((1, Ls, H), lambda b: (b, 0, 0)),
        pl.BlockSpec((1, 1, Ls), lambda b: (b, 0, 0)),
        _wspec((H, 3 * H)), _wspec((1, 3 * H)),
        _wspec((H, H)), _wspec((1, H)),
        _wspec((1, H)), _wspec((1, H)),
        _wspec((H, FF)), _wspec((1, FF)),
        _wspec((FF, H)), _wspec((1, H)),
        _wspec((1, H)), _wspec((1, H)),
    ]
    return pl.pallas_call(
        functools.partial(_enc_layer_kernel, eps=BERT_LN_EPS),
        grid=(B,),
        out_shape=jax.ShapeDtypeStruct((B, Ls, H), jnp.float32),
        in_specs=in_specs,
        out_specs=pl.BlockSpec((1, Ls, H), lambda b: (b, 0, 0)),
        compiler_params=pltpu.CompilerParams(dimension_semantics=("parallel",)),
    )(x, bias,
      lyr["wqkv"], lyr["bqkv"], lyr["wo"], lyr["bo"], lyr["ln1_g"], lyr["ln1_b"],
      lyr["w1"], lyr["b1"], lyr["w2"], lyr["b2"], lyr["ln2_g"], lyr["ln2_b"])


def dec_layer_forward(x, mem_bf16, self_bias, cross_bias, lyr):
    # x: (B, Lt, H) f32; mem_bf16: (B, Ls, H) bf16;
    # self_bias: (B, Lt, Lt) f32; cross_bias: (B, 1, Ls) f32
    B, Lt, H = x.shape
    Ls = mem_bf16.shape[1]
    in_specs = [
        pl.BlockSpec((1, Lt, H), lambda b: (b, 0, 0)),
        pl.BlockSpec((1, Ls, H), lambda b: (b, 0, 0)),
        pl.BlockSpec((1, Lt, Lt), lambda b: (b, 0, 0)),
        pl.BlockSpec((1, 1, Ls), lambda b: (b, 0, 0)),
        _wspec((1, H)), _wspec((1, H)),                    # ln1
        _wspec((H, 3 * H)), _wspec((1, 3 * H)),            # wqkv
        _wspec((H, H)), _wspec((1, H)),                    # wo
        _wspec((1, H)), _wspec((1, H)),                    # ln2
        _wspec((H, H)), _wspec((1, H)),                    # cwq
        _wspec((H, 2 * H)), _wspec((1, 2 * H)),            # cwkv
        _wspec((H, H)), _wspec((1, H)),                    # cwo
        _wspec((1, H)), _wspec((1, H)),                    # lnff
        _wspec((H, FF)), _wspec((1, FF)),                  # w1
        _wspec((FF, H)), _wspec((1, H)),                   # w2
    ]
    return pl.pallas_call(
        functools.partial(_dec_layer_kernel, eps=DEC_LN_EPS),
        grid=(B,),
        out_shape=jax.ShapeDtypeStruct((B, Lt, H), jnp.float32),
        in_specs=in_specs,
        out_specs=pl.BlockSpec((1, Lt, H), lambda b: (b, 0, 0)),
        compiler_params=pltpu.CompilerParams(dimension_semantics=("parallel",)),
    )(x, mem_bf16, self_bias, cross_bias,
      lyr["ln1_g"], lyr["ln1_b"], lyr["wqkv"], lyr["bqkv"], lyr["wo"], lyr["bo"],
      lyr["ln2_g"], lyr["ln2_b"], lyr["cwq"], lyr["cbq"], lyr["cwkv"], lyr["cbkv"],
      lyr["cwo"], lyr["cbo"], lyr["lnff_g"], lyr["lnff_b"],
      lyr["w1"], lyr["b1"], lyr["w2"], lyr["b2"])


def layernorm(x2d, g, b, eps):
    # Tiny standalone LN (embedding LN, decoder final LN) — whole-array resident.
    M, H = x2d.shape
    return pl.pallas_call(
        functools.partial(_layernorm_kernel, eps=eps),
        out_shape=jax.ShapeDtypeStruct((M, H), jnp.float32),
        in_specs=[pl.BlockSpec(memory_space=_VMEM)] * 3,
        out_specs=pl.BlockSpec(memory_space=_VMEM),
    )(x2d, g, b)


# ------------------------------- parameter init -------------------------------------
def init_params(key):
    keys = iter(jax.random.split(key, 256))

    def nrm(shape, dtype=jnp.bfloat16):
        return (0.02 * jax.random.normal(next(keys), shape, jnp.float32)).astype(dtype)

    def ones(n):
        return jnp.ones((1, n), jnp.float32)

    def zeros(n):
        return jnp.zeros((1, n), jnp.float32)

    p = {
        "word_emb": nrm((VOCAB, HIDDEN), jnp.float32),
        "pos_emb": nrm((MAX_POS, HIDDEN), jnp.float32),
        "seg_emb": nrm((TYPE_VOCAB, HIDDEN), jnp.float32),
        "emb_ln_g": ones(HIDDEN),
        "emb_ln_b": zeros(HIDDEN),
        "enc_layers": [],
        "dec_layers": [],
    }
    for _ in range(ENC_LAYERS):
        p["enc_layers"].append(dict(
            wqkv=nrm((HIDDEN, 3 * HIDDEN)), bqkv=zeros(3 * HIDDEN),
            wo=nrm((HIDDEN, HIDDEN)), bo=zeros(HIDDEN),
            ln1_g=ones(HIDDEN), ln1_b=zeros(HIDDEN),
            w1=nrm((HIDDEN, FF)), b1=zeros(FF),
            w2=nrm((FF, HIDDEN)), b2=zeros(HIDDEN),
            ln2_g=ones(HIDDEN), ln2_b=zeros(HIDDEN),
        ))
    # decoder embedding (nn.Embedding padding_idx=0 -> zero row 0)
    p["tgt_emb"] = nrm((VOCAB, HIDDEN), jnp.float32).at[0].set(0.0)
    for _ in range(DEC_LAYERS):
        p["dec_layers"].append(dict(
            ln1_g=ones(HIDDEN), ln1_b=zeros(HIDDEN),
            wqkv=nrm((HIDDEN, 3 * HIDDEN)), bqkv=zeros(3 * HIDDEN),
            wo=nrm((HIDDEN, HIDDEN)), bo=zeros(HIDDEN),
            ln2_g=ones(HIDDEN), ln2_b=zeros(HIDDEN),
            cwq=nrm((HIDDEN, HIDDEN)), cbq=zeros(HIDDEN),
            cwkv=nrm((HIDDEN, 2 * HIDDEN)), cbkv=zeros(2 * HIDDEN),
            cwo=nrm((HIDDEN, HIDDEN)), cbo=zeros(HIDDEN),
            lnff_g=ones(HIDDEN), lnff_b=zeros(HIDDEN),
            w1=nrm((HIDDEN, FF)), b1=zeros(FF),
            w2=nrm((FF, HIDDEN)), b2=zeros(HIDDEN),
        ))
    p["dec_final_ln_g"] = ones(HIDDEN)
    p["dec_final_ln_b"] = zeros(HIDDEN)
    return p


# ----------------------------------- BERT encoder -----------------------------------
def bert_encode(params, src, segs, mask_src):
    B, Ls = src.shape
    pos = jnp.arange(Ls, dtype=jnp.int32)
    h = params["word_emb"][src] + params["pos_emb"][pos][None, :, :] + params["seg_emb"][segs]
    x = layernorm(h.reshape(B * Ls, HIDDEN),
                  params["emb_ln_g"], params["emb_ln_b"], BERT_LN_EPS).reshape(B, Ls, HIDDEN)

    # BERT extended attention mask, key-only: (B, 1, Ls); -10000.0 is the BERT convention.
    enc_bias = ((1.0 - mask_src.astype(jnp.float32)) * -10000.0)[:, None, :]

    for lyr in params["enc_layers"]:
        x = enc_layer_forward(x, enc_bias, lyr)   # whole layer fused in one kernel
    return x


# ------------------------------ PreSumm TransformerDecoder --------------------------
def sinusoidal_pe(length, dim):
    pos = jnp.arange(length, dtype=jnp.float32)[:, None]
    div = jnp.exp(jnp.arange(0, dim, 2, dtype=jnp.float32) * -(math.log(10000.0) / dim))
    pe = jnp.zeros((length, dim), jnp.float32)
    pe = pe.at[:, 0::2].set(jnp.sin(pos * div))
    pe = pe.at[:, 1::2].set(jnp.cos(pos * div))
    return pe


def decode(params, tgt_in, top_vec, src):
    B, Lt = tgt_in.shape

    # embeddings * sqrt(dim) + sinusoidal positional encoding (dropout = identity)
    x = params["tgt_emb"][tgt_in] * math.sqrt(HIDDEN) + sinusoidal_pe(Lt, HIDDEN)[None]

    # self-attn mask: pad OR causal -> additive bias shared across heads: (B, Lt, Lt)
    tgt_pad = (tgt_in == 0)
    causal = jnp.triu(jnp.ones((Lt, Lt), bool), k=1)
    self_bias = jnp.where(tgt_pad[:, None, :] | causal[None, :, :], -1e9, 0.0).astype(jnp.float32)

    # cross-attn mask from src padding, key-only: (B, 1, Ls)
    cross_bias = jnp.where((src == 0)[:, None, :], -1e9, 0.0).astype(jnp.float32)

    # encoder memory is only consumed by the fused K|V matmul -> ship it bf16
    mem_bf16 = top_vec.astype(jnp.bfloat16)

    for lyr in params["dec_layers"]:
        x = dec_layer_forward(x, mem_bf16, self_bias, cross_bias, lyr)  # fused layer

    x = layernorm(x.reshape(B * Lt, HIDDEN),
                  params["dec_final_ln_g"], params["dec_final_ln_b"], DEC_LN_EPS)
    return x.reshape(B, Lt, HIDDEN)


# ------------------------------- AbsSummarizer.forward ------------------------------
def abs_summarizer_forward(params, src, tgt, segs, clss, mask_src, mask_tgt, mask_cls):
    top_vec = bert_encode(params, src, segs, mask_src)           # bert(src, segs, mask_src)[0]
    decoder_outputs = decode(params, tgt[:, :-1], top_vec, src)  # decoder(tgt[:, :-1], top_vec)
    return decoder_outputs, None                                  # generator NOT applied in forward


# -------------------------------------- main ----------------------------------------
if __name__ == "__main__":
    key = jax.random.PRNGKey(0)
    k_params, k_src, k_tgt, k_seg = jax.random.split(key, 4)

    params = init_params(k_params)

    B, Ls, Lt = 2, 16, 8
    src = jax.random.randint(k_src, (B, Ls), 1, VOCAB, dtype=jnp.int32)
    tgt = jax.random.randint(k_tgt, (B, Lt), 1, VOCAB, dtype=jnp.int32)
    segs = jax.random.randint(k_seg, (B, Ls), 0, TYPE_VOCAB, dtype=jnp.int32)

    # add some padding on batch 1 to exercise the masks
    src = src.at[1, -2:].set(0)
    tgt = tgt.at[1, -1].set(0)
    mask_src = (src != 0).astype(jnp.float32)
    mask_tgt = (tgt != 0).astype(jnp.float32)
    clss = jnp.zeros((B, 2), jnp.int32)
    mask_cls = jnp.ones((B, 2), jnp.float32)

    dec_out, _ = abs_summarizer_forward(params, src, tgt, segs, clss,
                                        mask_src, mask_tgt, mask_cls)
    dec_out = jax.block_until_ready(dec_out)
    assert dec_out.shape == (B, Lt - 1, HIDDEN)
    assert bool(jnp.all(jnp.isfinite(dec_out)))
    print("KERNEL_OK")
</pallas_src>

<mosaic_0001>
module attributes {stable_mosaic.version = 11 : i64} {
  func.func @_layernorm_kernel(%arg0: memref<32x256xf32, #tpu.memory_space<vmem>>, %arg1: memref<1x256xf32, #tpu.memory_space<vmem>>, %arg2: memref<1x256xf32, #tpu.memory_space<vmem>>, %arg3: memref<32x256xf32, #tpu.memory_space<vmem>>) attributes {dimension_semantics = [], scalar_prefetch = 0 : i64, scratch_operands = 0 : i64, tpu.core_type = #tpu.core_type<tc>} {
    %c0 = arith.constant 0 : index
    %c0_0 = arith.constant 0 : index
    %0 = vector.load %arg0[%c0, %c0_0] : memref<32x256xf32, #tpu.memory_space<vmem>>, vector<32x256xf32>
    %c0_1 = arith.constant 0 : index
    %c0_2 = arith.constant 0 : index
    %1 = vector.load %arg1[%c0_1, %c0_2] : memref<1x256xf32, #tpu.memory_space<vmem>>, vector<1x256xf32>
    %c0_3 = arith.constant 0 : index
    %c0_4 = arith.constant 0 : index
    %2 = vector.load %arg2[%c0_3, %c0_4] : memref<1x256xf32, #tpu.memory_space<vmem>>, vector<1x256xf32>
    %cst = arith.constant dense<0.000000e+00> : vector<32xf32>
    %3 = vector.multi_reduction <add>, %0, %cst [1] : vector<32x256xf32> to vector<32xf32>
    %4 = vector.shape_cast %3 : vector<32xf32> to vector<32x1xf32>
    %cst_5 = arith.constant 2.560000e+02 : f32
    %5 = vector.broadcast %cst_5 : f32 to vector<32x1xf32>
    %6 = arith.divf %4, %5 : vector<32x1xf32>
    %7 = vector.broadcast %6 : vector<32x1xf32> to vector<32x256xf32>
    %8 = arith.subf %0, %7 : vector<32x256xf32>
    %9 = arith.mulf %8, %8 : vector<32x256xf32>
    %cst_6 = arith.constant dense<0.000000e+00> : vector<32xf32>
    %10 = vector.multi_reduction <add>, %9, %cst_6 [1] : vector<32x256xf32> to vector<32xf32>
    %11 = vector.shape_cast %10 : vector<32xf32> to vector<32x1xf32>
    %cst_7 = arith.constant 2.560000e+02 : f32
    %12 = vector.broadcast %cst_7 : f32 to vector<32x1xf32>
    %13 = arith.divf %11, %12 : vector<32x1xf32>
    %cst_8 = arith.constant 9.99999996E-13 : f32
    %14 = vector.broadcast %cst_8 : f32 to vector<32x1xf32>
    %15 = arith.addf %13, %14 : vector<32x1xf32>
    %16 = math.rsqrt %15 : vector<32x1xf32>
    %17 = vector.broadcast %16 : vector<32x1xf32> to vector<32x256xf32>
    %18 = arith.mulf %8, %17 : vector<32x256xf32>
    %19 = vector.broadcast %1 : vector<1x256xf32> to vector<32x256xf32>
    %20 = arith.mulf %18, %19 : vector<32x256xf32>
    %21 = vector.broadcast %2 : vector<1x256xf32> to vector<32x256xf32>
    %22 = arith.addf %20, %21 : vector<32x256xf32>
    %c0_9 = arith.constant 0 : index
    %c0_10 = arith.constant 0 : index
    %23 = vector.load %arg3[%c0_9, %c0_10] : memref<32x256xf32, #tpu.memory_space<vmem>>, vector<32x256xf32>
    tpu.vector_store %arg3[%c0_9, %c0_10], %22 {strides = array<i32>} : memref<32x256xf32, #tpu.memory_space<vmem>>, vector<32x256xf32>,
    return
  }
}

</mosaic_0001>

<bundles_post_ra>
// kernel: tpu_custom_call.1
= control target key start
LH: loop header
LB: loop body
LE: loop exit
PB: predicated region body
PF: predicated region fallthrough
CT: control target
= control target key end

     0   :  { %8 = vsyncpa [#allocation3], 0  ;;  %s433_s0 = inlined_call_operand.hbm [shape: f32[32,256], index: 0, kind: input, shape index: {}]   ;;  %s434_s1 = inlined_call_operand.hbm [shape: f32[1,256], index: 1, kind: input, shape index: {}]   ;;  %s435_s2 = inlined_call_operand.hbm [shape: f32[1,256], index: 2, kind: input, shape index: {}]   ;;  %s436_s3 = inlined_call_operand.hbm [shape: f32[32,256], index: 3, kind: output, shape index: {}]  }
   0x1   :  { %9 = vsyncpa [#allocation6], 0  ;;  %s29_s14 = sshll.u32 %s434_s1, 4  ;;  %s30_s14 = int_to_ptr.hbm [resolvable:$true] %s29_s14 }
   0x2   :  { %10 = vsyncpa [#allocation4], 0  ;;  %s348_s15 = smov [#allocation5]   ;;  %s15_s19 = sshll.u32 %s433_s0, 4  ;;  %s16_s19 = int_to_ptr.hbm [resolvable:$true] %s15_s19 }
   0x3   :  { %s31_s16 = sshll.u32 %s348_s15, 4  ;;  %s349_s20 = smov [#allocation2]   ;;  %s32_s16 = int_to_ptr.vmem [resolvable:$true] %s31_s16 }
   0x4   :  { %34 = dma.hbm_to_vmem [thread:$0]  %s30_s14, 32, %s32_s16, [#allocation6]  }
   0x5   :  { %s17_s21 = sshll.u32 %s349_s20, 4  ;;  %s350_s22 = smov 256   ;;  %s18_s21 = int_to_ptr.vmem [resolvable:$true] %s17_s21 }
   0x6   :  { %s351_s23 = smov 16   ;;  %s40_s25 = sshll.u32 %s435_s2, 4  ;;  %s41_s25 = int_to_ptr.hbm [resolvable:$true] %s40_s25 }
   0x7   :  { %23 = dma.hbm_to_vmem [thread:$0]  %s16_s19, 1024, %s18_s21, [#allocation3], %s350_s22, %s350_s22, %s351_s23  }
   0x8   :  { %s352_s26 = smov [#allocation7]  }
   0x9   :  { %s42_s27 = sshll.u32 %s352_s26, 4  ;;  %s43_s27 = int_to_ptr.vmem [resolvable:$true] %s42_s27 }
   0xa   :  { %45 = dma.hbm_to_vmem [thread:$0]  %s41_s25, 32, %s43_s27, [#allocation6]  }
   0xb   :  { %342 = dma.done.wait [#allocation3], 1024  }
   0xc   :  { %343 = vsyncadd [#allocation3], 4294966272 }
   0xd   :  { %344 = dma.done.wait [#allocation6], 64  }
   0xe   :  { %345 = vsyncadd [#allocation6], 4294967232  ;;  %v62_v0 = vld [vmem:[#allocation2 + $0x20] sm:$0xff]  ;;  %v63_v1 = vld [vmem:[#allocation2 + $0x28] sm:$0xff]  ;;  %v353_v12 = vmov 256.0   ;;  %s354_s0 = smov [#allocation8]  }
   0xf   :  { %v58_v2 = vld [vmem:[#allocation2] sm:$0xff]  ;;  %v74_v3 = vadd.f32 %v63_v1, %v62_v0  ;;  %v59_v4 = vld [vmem:[#allocation2 + $0x8] sm:$0xff]  ;;  %v64_v6 = vld [vmem:[#allocation2 + $0x30] sm:$0xff]  ;;  %236 = vrcp.f32 %v353_v12  ;;  %s213_s2 = sshll.u32 %s354_s0, 4  ;;  %s215_s30 = sshll.u32 %s436_s3, 4  ;;  %s214_s2 = int_to_ptr.vmem [resolvable:$true] %s213_s2  ;;  %s216_s30 = int_to_ptr.hbm [resolvable:$true] %s215_s30 }
  0x10   :  { %v68_v5 = vadd.f32 %v59_v4, %v58_v2  ;;  %v65_v7 = vld [vmem:[#allocation2 + $0x38] sm:$0xff]  ;;  %v60_v8 = vld [vmem:[#allocation2 + $0x10] sm:$0xff] }
  0x11   :  { %75 = vadd.xlane.f32.xlu1 %v74_v3  ;;  %v61_v9 = vld [vmem:[#allocation2 + $0x18] sm:$0xff]  ;;  %v77_v10 = vadd.f32 %v65_v7, %v64_v6 }
  0x12   :  { %69 = vadd.xlane.f32.xlu0 %v68_v5  ;;  %v71_v11 = vadd.f32 %v61_v9, %v60_v8 }
  0x15   :  { %v237_v13 = vpop.eup %236 }
  0x16   :  { %v81_v14 = vmul.f32 256.0, %v237_v13  ;;  %vm85_vm0 = vweird.f32 %v237_v13 }
  0x18   :  { %v82_v15 = vsub.f32 1.0, %v81_v14 }
  0x19   :  { %78 = vadd.xlane.f32.xlu1 %v77_v10 }
  0x1a   :  { %72 = vadd.xlane.f32.xlu0 %v71_v11  ;;  %v83_v16 = vmul.f32 %v237_v13, %v82_v15 }
  0x1c   :  { %v84_v17 = vadd.f32 %v237_v13, %v83_v16 }
  0x1e   :  { %v86_v18 = vsel %vm85_vm0, %v237_v13, %v84_v17 }
  0x84   :  { %v76_v19 = vpop.xlane.xlu1 %75 }
  0x85   :  { %v89_v20 = vmul.f32 %v86_v18, %v76_v19  ;;  %v70_v21 = vpop.xlane.xlu0 %69 }
  0x86   :  { %v87_v22 = vmul.f32 %v86_v18, %v70_v21 }
  0x87   :  { %v387_v23 = vsub.f32 %v62_v0, %v89_v20  ;;  %v389_v24 = vsub.f32 %v63_v1, %v89_v20 }
  0x88   :  { %v391_v25 = vsub.f32 %v58_v2, %v87_v22  ;;  %v393_v26 = vsub.f32 %v59_v4, %v87_v22  ;;  %v66_v2 = vld [vmem:[#allocation5] sm:$0x3] }
  0x89   :  { %v103_v27 = vmul.f32 %v387_v23, %v387_v23  ;;  %v104_v28 = vmul.f32 %v389_v24, %v389_v24  ;;  %v177_v12 = vperm.slane %v66_v2, 1 }
  0x8a   :  { %v99_v29 = vmul.f32 %v391_v25, %v391_v25  ;;  %v100_v30 = vmul.f32 %v393_v26, %v393_v26 }
  0x8b   :  { %v113_v31 = vadd.f32 %v104_v28, %v103_v27 }
  0x8c   :  { %v79_v32 = vpop.xlane.xlu1 %78  ;;  %v107_v33 = vadd.f32 %v100_v30, %v99_v29 }
  0x8d   :  { %v90_v34 = vmul.f32 %v86_v18, %v79_v32  ;;  %v73_v35 = vpop.xlane.xlu0 %72  ;;  %114 = vadd.xlane.f32.xlu0 %v113_v31 }
  0x8e   :  { %v88_v36 = vmul.f32 %v86_v18, %v73_v35  ;;  %108 = vadd.xlane.f32.xlu2 %v107_v33 }
  0x8f   :  { %v403_v37 = vsub.f32 %v64_v6, %v90_v34  ;;  %v405_v38 = vsub.f32 %v65_v7, %v90_v34  ;;  %v67_v6 = vld [vmem:[#allocation7] sm:$0x3] }
  0x90   :  { %v407_v39 = vsub.f32 %v60_v8, %v88_v36  ;;  %v409_v40 = vsub.f32 %v61_v9, %v88_v36  ;;  %v176_v9 = vperm.slane %v66_v2, 0  ;;  %v189_v15 = vperm.slane %v67_v6, 0 }
  0x91   :  { %v105_v41 = vmul.f32 %v403_v37, %v403_v37  ;;  %v106_v42 = vmul.f32 %v405_v38, %v405_v38  ;;  %v190_v22 = vperm.slane %v67_v6, 1 }
  0x92   :  { %v101_v43 = vmul.f32 %v407_v39, %v407_v39  ;;  %v102_v44 = vmul.f32 %v409_v40, %v409_v40 }
  0x93   :  { %v116_v45 = vadd.f32 %v106_v42, %v105_v41 }
  0x94   :  { %v110_v46 = vadd.f32 %v102_v44, %v101_v43 }
  0x95   :  { %117 = vadd.xlane.f32.xlu1 %v116_v45 }
  0x96   :  { %111 = vadd.xlane.f32.xlu2 %v110_v46 }
 0x100   :  { %v115_v47 = vpop.xlane.xlu0 %114 }
 0x101   :  { %v109_v48 = vpop.xlane.xlu2 %108  ;;  %v121_v49 = vmul.f32 %v115_v47, %v86_v18 }
 0x102   :  { %v119_v50 = vmul.f32 %v109_v48, %v86_v18 }
 0x103   :  { %v125_v51 = vadd.f32 1e-12, %v121_v49 }
 0x104   :  { %v123_v52 = vadd.f32 1e-12, %v119_v50 }
 0x105   :  { %238 = vrsqrt.f32 %v125_v51  ;;  %vm153_vm3 = vweird.f32 %v125_v51 }
 0x106   :  { %240 = vrsqrt.f32 %v123_v52  ;;  %vm133_vm4 = vweird.f32 %v123_v52 }
 0x108   :  { %v118_v53 = vpop.xlane.xlu1 %117 }
 0x109   :  { %v122_v54 = vmul.f32 %v118_v53, %v86_v18  ;;  %v112_v55 = vpop.xlane.xlu2 %111 }
 0x10a   :  { %v120_v56 = vmul.f32 %v112_v55, %v86_v18 }
 0x10b   :  { %v239_v57 = vpop.eup %238  ;;  %v126_v58 = vadd.f32 1e-12, %v122_v54 }
 0x10c   :  { %v241_v59 = vpop.eup %240  ;;  %v148_v60 = vmul.f32 %v239_v57, %v125_v51  ;;  %v124_v61 = vadd.f32 1e-12, %v120_v56  ;;  %vm154_vm1 = vweird.f32 %v239_v57 }
 0x10d   :  { %v128_v62 = vmul.f32 %v241_v59, %v123_v52  ;;  %242 = vrsqrt.f32 %v126_v58  ;;  %vm134_vm2 = vweird.f32 %v241_v59  ;;  %vm155_vm5 = vmor %vm153_vm3, %vm154_vm1  ;;  %vm163_vm8 = vweird.f32 %v126_v58 }
 0x10e   :  { %v149_v63 = vmul.f32 %v239_v57, %v148_v60  ;;  %244 = vrsqrt.f32 %v124_v61  ;;  %vm135_vm6 = vmor %vm133_vm4, %vm134_vm2  ;;  %vm143_vm11 = vweird.f32 %v124_v61 }
 0x10f   :  { %v129_v0 = vmul.f32 %v241_v59, %v128_v62 }
 0x110   :  { %v150_v1 = vmul.f32 0.5, %v149_v63 }
 0x111   :  { %v130_v3 = vmul.f32 0.5, %v129_v0 }
 0x112   :  { %v151_v4 = vsub.f32 1.5, %v150_v1 }
 0x113   :  { %v243_v5 = vpop.eup %242  ;;  %v131_v7 = vsub.f32 1.5, %v130_v3 }
 0x114   :  { %v245_v8 = vpop.eup %244  ;;  %v152_v10 = vmul.f32 %v239_v57, %v151_v4  ;;  %v158_v11 = vmul.f32 %v243_v5, %v126_v58  ;;  %vm164_vm7 = vweird.f32 %v243_v5 }
 0x115   :  { %v132_v13 = vmul.f32 %v241_v59, %v131_v7  ;;  %v138_v14 = vmul.f32 %v245_v8, %v124_v61  ;;  %vm144_vm9 = vweird.f32 %v245_v8  ;;  %vm165_vm10 = vmor %vm163_vm8, %vm164_vm7 }
 0x116   :  { %v156_v16 = vsel %vm155_vm5, %v239_v57, %v152_v10  ;;  %v159_v17 = vmul.f32 %v243_v5, %v158_v11  ;;  %vm145_vm12 = vmor %vm143_vm11, %vm144_vm9 }
 0x117   :  { %v136_v18 = vsel %vm135_vm6, %v241_v59, %v132_v13  ;;  %v171_v19 = vmul.f32 %v156_v16, %v387_v23  ;;  %v172_v20 = vmul.f32 %v156_v16, %v389_v24  ;;  %v139_v21 = vmul.f32 %v245_v8, %v138_v14 }
 0x118   :  { %v167_v27 = vmul.f32 %v136_v18, %v391_v25  ;;  %v168_v28 = vmul.f32 %v136_v18, %v393_v26  ;;  %v160_v29 = vmul.f32 0.5, %v159_v17 }
 0x119   :  { %v184_v30 = vmul.f32 %v176_v9, %v171_v19  ;;  %v185_v31 = vmul.f32 %v177_v12, %v172_v20  ;;  %v140_v32 = vmul.f32 0.5, %v139_v21 }
 0x11a   :  { %v180_v33 = vmul.f32 %v176_v9, %v167_v27  ;;  %v181_v34 = vmul.f32 %v177_v12, %v168_v28  ;;  %v161_v35 = vsub.f32 1.5, %v160_v29 }
 0x11b   :  { %v197_v36 = vadd.f32 %v189_v15, %v184_v30  ;;  %v141_v41 = vsub.f32 1.5, %v140_v32  ;;  %v198_v42 = vadd.f32 %v190_v22, %v185_v31 }
 0x11c   :  { %v193_v23 = vadd.f32 %v189_v15, %v180_v33  ;;  %v194_v24 = vadd.f32 %v190_v22, %v181_v34  ;;  %v162_v43 = vmul.f32 %v243_v5, %v161_v35 }
 0x11d   :  { %205 = vst [vmem:[#allocation8 + $0x20] sm:$0xff] %v197_v36  ;;  %v142_v25 = vmul.f32 %v245_v8, %v141_v41 }
 0x11e   :  { %201 = vst [vmem:[#allocation8] sm:$0xff] %v193_v23  ;;  %v166_v26 = vsel %vm165_vm10, %v243_v5, %v162_v43 }
 0x11f   :  { %202 = vst [vmem:[#allocation8 + $0x8] sm:$0xff] %v194_v24  ;;  %v173_v44 = vmul.f32 %v166_v26, %v403_v37  ;;  %v174_v45 = vmul.f32 %v166_v26, %v405_v38  ;;  %v146_v46 = vsel %vm145_vm12, %v245_v8, %v142_v25 }
 0x120   :  { %206 = vst [vmem:[#allocation8 + $0x28] sm:$0xff] %v198_v42  ;;  %v169_v47 = vmul.f32 %v146_v46, %v407_v39  ;;  %v170_v48 = vmul.f32 %v146_v46, %v409_v40 }
 0x121   :  { %v186_v49 = vmul.f32 %v176_v9, %v173_v44  ;;  %v187_v50 = vmul.f32 %v177_v12, %v174_v45 }
 0x122   :  { %v182_v51 = vmul.f32 %v176_v9, %v169_v47  ;;  %v183_v52 = vmul.f32 %v177_v12, %v170_v48 }
 0x123   :  { %v199_v53 = vadd.f32 %v189_v15, %v186_v49  ;;  %v200_v54 = vadd.f32 %v190_v22, %v187_v50 }
 0x124   :  { %v195_v37 = vadd.f32 %v189_v15, %v182_v51  ;;  %v196_v38 = vadd.f32 %v190_v22, %v183_v52 }
 0x125   :  { %207 = vst [vmem:[#allocation8 + $0x30] sm:$0xff] %v199_v53 }
 0x126   :  { %208 = vst [vmem:[#allocation8 + $0x38] sm:$0xff] %v200_v54 }
 0x127   :  { %203 = vst [vmem:[#allocation8 + $0x10] sm:$0xff] %v195_v37 }
 0x128   :  { %204 = vst [vmem:[#allocation8 + $0x18] sm:$0xff] %v196_v38 }
 0x129   :  { %221 = dma.vmem_to_hbm [thread:$0]  %s214_s2, 1024, %s216_s30, [#allocation4], %s350_s22, %s350_s22, %s351_s23  }
 0x12a   :  { %346 = dma.done.wait [#allocation4], 1024  }
 0x12b   :  { %347 = vsyncadd [#allocation4], 4294966272 }
 0x12c   :  { %226 = vsyncpa [#allocation3], 1 }
 0x12d   :  { %227 = vsyncpa [#allocation6], 1 }
 0x12e   :  { %228 = vsyncpa [#allocation4], 1 }

</bundles_post_ra>
